<compile_context>
chip_gen: v6e
topology: v6e:2x2x1
jax: 0.10.0
libtpu: 0.0.40
codegen_flags: <defaults>
</compile_context>

<pallas_src>
import numpy as np
import jax
import jax.numpy as jnp
from jax.experimental import pallas as pl
from jax.experimental.pallas import tpu as pltpu


def lr_kernel(cstart_ref, cend_ref, x_ref, out_ref, pos_ref):
    # cstart_ref / cend_ref : (1, 1, T)   int32   exclusive / inclusive cumsum
    # x_ref                 : (1, T, Dp)  x.dtype
    # out_ref               : (1, TM, Dp) x.dtype
    # pos_ref               : (1, 1, TM)  int32
    T = x_ref.shape[1]
    TM = out_ref.shape[1]
    m0 = pl.program_id(1) * TM  # global mel offset of this tile

    cstart = cstart_ref[0]  # (1, T)
    cend = cend_ref[0]      # (1, T)

    # W[m, i] = 1  iff  cstart[i] <= (m0 + m) < cend[i]
    m_ids = m0 + jax.lax.broadcasted_iota(jnp.int32, (TM, T), 0)      # (TM, T)
    W = jnp.logical_and(m_ids >= cstart, m_ids < cend).astype(x_ref.dtype)

    out_ref[0] = jnp.dot(W, x_ref[0],
                         preferred_element_type=jnp.float32).astype(out_ref.dtype)

    # Total mel length for this batch = last element of inclusive cumsum.
    total = cend_ref[0, 0, T - 1]
    mrow = m0 + jax.lax.broadcasted_iota(jnp.int32, (1, TM), 1)       # (1, TM)
    pos_ref[0] = jnp.where(mrow < total, mrow + 1, 0)


def length_regulator(x, duration, max_mel, *, tile_m=256):
    """x: (B, T, D), duration: (B, T) int32, max_mel: static int (host-computed)."""
    B, T, D = x.shape
    round_up = lambda v, m: ((v + m - 1) // m) * m

    # Lane-dense output: pad channel dim to a multiple of 128.
    D_pad = round_up(max(D, 128), 128)
    # Mel tile: multiple of 128 (so the pos block's last dim is 128-aligned),
    # capped so tiny utterances don't get a huge tile.
    TM = round_up(min(tile_m, round_up(max_mel, 128)), 128)
    M_pad = round_up(max_mel, TM)

    dur = duration.astype(jnp.int32)
    cend = jnp.cumsum(dur, axis=1).reshape(B, 1, T)       # inclusive, exact int32
    cstart = cend - dur.reshape(B, 1, T)                   # exclusive

    x_pad = x if D_pad == D else jnp.pad(x, ((0, 0), (0, 0), (0, D_pad - D)))

    cost = pl.CostEstimate(
        flops=2 * B * M_pad * T * D_pad,
        transcendentals=0,
        bytes_accessed=4 * (B * M_pad * D_pad + B * T * D_pad + B * M_pad + 2 * B * T),
    )

    out, pos = pl.pallas_call(
        lr_kernel,
        out_shape=(
            jax.ShapeDtypeStruct((B, M_pad, D_pad), x.dtype),
            jax.ShapeDtypeStruct((B, 1, M_pad), jnp.int32),
        ),
        grid=(B, M_pad // TM),
        in_specs=[
            pl.BlockSpec((1, 1, T), lambda b, m: (b, 0, 0)),       # cstart
            pl.BlockSpec((1, 1, T), lambda b, m: (b, 0, 0)),       # cend
            pl.BlockSpec((1, T, D_pad), lambda b, m: (b, 0, 0)),   # x
        ],
        out_specs=(
            pl.BlockSpec((1, TM, D_pad), lambda b, m: (b, m, 0)),  # output tile
            pl.BlockSpec((1, 1, TM), lambda b, m: (b, 0, m)),      # mel_pos tile
        ),
        compiler_params=pltpu.CompilerParams(
            dimension_semantics=("parallel", "parallel")),
        cost_estimate=cost,
    )(cstart, cend, x_pad)

    return out[:, :max_mel, :D], pos.reshape(B, M_pad)[:, :max_mel]


def ref_length_regulator(x_np, dur_np):
    """Pure-numpy reference matching the PyTorch LR (max_length=None path)."""
    B, T, D = x_np.shape
    totals = dur_np.sum(axis=1)
    M = int(totals.max())
    out = np.zeros((B, M, D), dtype=x_np.dtype)
    pos = np.zeros((B, M), dtype=np.int32)
    for b in range(B):
        rows = np.repeat(np.arange(T), dur_np[b])
        L = len(rows)
        out[b, :L] = x_np[b, rows]
        pos[b, :L] = np.arange(1, L + 1, dtype=np.int32)
    return out, pos


if __name__ == "__main__":
    key = jax.random.PRNGKey(0)
    kx, kd = jax.random.split(key)

    B, T, D = 2, 8, 32
    x = jax.random.normal(kx, (B, T, D), dtype=jnp.float32)
    duration = jax.random.randint(kd, (B, T), minval=1, maxval=5, dtype=jnp.int32)

    # max mel length is data-dependent -> make it static on the host (as the
    # PyTorch module effectively does by building Python lists).
    # TODO(synk): for production, bucket max_mel to avoid one recompile per value.
    dur_np = np.asarray(duration)
    max_mel = int(dur_np.sum(axis=1).max())

    out, mel_pos = length_regulator(x, duration, max_mel)
    out = jax.block_until_ready(out)
    mel_pos = jax.block_until_ready(mel_pos)

    ref_out, ref_pos = ref_length_regulator(np.asarray(x), dur_np)
    assert out.shape == ref_out.shape and mel_pos.shape == ref_pos.shape
    assert np.allclose(np.asarray(out), ref_out, atol=1e-5)
    assert np.array_equal(np.asarray(mel_pos), ref_pos)

    print("KERNEL_OK")
</pallas_src>

<mosaic_0001>
module attributes {stable_mosaic.version = 11 : i64} {
  func.func @lr_kernel(%arg0: i32, %arg1: i32, %arg2: memref<1x1x8xi32, #tpu.memory_space<vmem>>, %arg3: memref<1x1x8xi32, #tpu.memory_space<vmem>>, %arg4: memref<1x8x128xf32, #tpu.memory_space<vmem>>, %arg5: memref<1x128x128xf32, #tpu.memory_space<vmem>>, %arg6: memref<1x1x128xi32, #tpu.memory_space<vmem>>) attributes {dimension_semantics = [#tpu.dimension_semantics<parallel>, #tpu.dimension_semantics<parallel>], iteration_bounds = array<i64: 2, 1>, scalar_prefetch = 0 : i64, scratch_operands = 0 : i64, tpu.core_type = #tpu.core_type<tc>, window_params = [{transform_indices = @transform_0, window_bounds = array<i64: 1, 1, 8>}, {transform_indices = @transform_1, window_bounds = array<i64: 1, 1, 8>}, {transform_indices = @transform_2, window_bounds = array<i64: 1, 8, 128>}, {transform_indices = @transform_3, window_bounds = array<i64: 1, 128, 128>}, {transform_indices = @transform_4, window_bounds = array<i64: 1, 1, 128>}]} {
    %c128_i32 = arith.constant 128 : i32
    %0 = arith.muli %arg1, %c128_i32 : i32
    %c0 = arith.constant 0 : index
    %c0_0 = arith.constant 0 : index
    %c0_1 = arith.constant 0 : index
    %1 = vector.load %arg2[%c0, %c0_0, %c0_1] : memref<1x1x8xi32, #tpu.memory_space<vmem>>, vector<1x1x8xi32>
    %2 = vector.shape_cast %1 : vector<1x1x8xi32> to vector<1x8xi32>
    %c0_2 = arith.constant 0 : index
    %c0_3 = arith.constant 0 : index
    %c0_4 = arith.constant 0 : index
    %3 = vector.load %arg3[%c0_2, %c0_3, %c0_4] : memref<1x1x8xi32, #tpu.memory_space<vmem>>, vector<1x1x8xi32>
    %4 = vector.shape_cast %3 : vector<1x1x8xi32> to vector<1x8xi32>
    %5 = tpu.iota {dimensions = array<i32: 0>} : vector<128x8xi32>
    %6 = vector.broadcast %0 : i32 to vector<128x8xi32>
    %7 = arith.addi %6, %5 : vector<128x8xi32>
    %8 = vector.broadcast %2 : vector<1x8xi32> to vector<128x8xi32>
    %9 = arith.cmpi sge, %7, %8 : vector<128x8xi32>
    %10 = vector.broadcast %4 : vector<1x8xi32> to vector<128x8xi32>
    %11 = arith.cmpi slt, %7, %10 : vector<128x8xi32>
    %12 = arith.andi %9, %11 : vector<128x8xi1>
    %13 = arith.extui %12 : vector<128x8xi1> to vector<128x8xi32>
    %14 = arith.sitofp %13 : vector<128x8xi32> to vector<128x8xf32>
    %c0_5 = arith.constant 0 : index
    %c0_6 = arith.constant 0 : index
    %c0_7 = arith.constant 0 : index
    %15 = vector.load %arg4[%c0_5, %c0_6, %c0_7] : memref<1x8x128xf32, #tpu.memory_space<vmem>>, vector<1x8x128xf32>
    %16 = vector.shape_cast %15 : vector<1x8x128xf32> to vector<8x128xf32>
    %cst = arith.constant dense<0.000000e+00> : vector<128x128xf32>
    %17 = tpu.matmul %14, %16, %cst {dimension_numbers = #tpu.dot_dimension_numbers<[1], [0], [0], [1], [0, 0, 1, 1], [], []>} : vector<128x8xf32>, vector<8x128xf32>, vector<128x128xf32> -> vector<128x128xf32>
    %c0_8 = arith.constant 0 : index
    %c0_9 = arith.constant 0 : index
    %c0_10 = arith.constant 0 : index
    %18 = vector.load %arg5[%c0_8, %c0_9, %c0_10] : memref<1x128x128xf32, #tpu.memory_space<vmem>>, vector<1x128x128xf32>
    %19 = vector.shape_cast %18 : vector<1x128x128xf32> to vector<128x128xf32>
    %20 = vector.shape_cast %17 : vector<128x128xf32> to vector<1x128x128xf32>
    tpu.vector_store %arg5[%c0_8, %c0_9, %c0_10], %20 {strides = array<i32>} : memref<1x128x128xf32, #tpu.memory_space<vmem>>, vector<1x128x128xf32>,
    %c0_11 = arith.constant 0 : index
    %c0_12 = arith.constant 0 : index
    %c7 = arith.constant 7 : index
    %21 = vector.load %arg3[%c0_11, %c0_12, %c7] : memref<1x1x8xi32, #tpu.memory_space<vmem>>, vector<1x1x1xi32>
    %22 = vector.extract %21[0, 0, 0] : i32 from vector<1x1x1xi32>
    %23 = tpu.iota {dimensions = array<i32: 1>} : vector<1x128xi32>
    %24 = vector.broadcast %0 : i32 to vector<1x128xi32>
    %25 = arith.addi %24, %23 : vector<1x128xi32>
    %26 = vector.broadcast %22 : i32 to vector<1x128xi32>
    %27 = arith.cmpi slt, %25, %26 : vector<1x128xi32>
    %c1_i32 = arith.constant 1 : i32
    %28 = vector.broadcast %c1_i32 : i32 to vector<1x128xi32>
    %29 = arith.addi %25, %28 : vector<1x128xi32>
    %c0_i32 = arith.constant 0 : i32
    %30 = vector.broadcast %c0_i32 : i32 to vector<1x128xi32>
    %31 = arith.select %27, %29, %30 : vector<1x128xi1>, vector<1x128xi32>
    %c0_13 = arith.constant 0 : index
    %c0_14 = arith.constant 0 : index
    %c0_15 = arith.constant 0 : index
    %32 = vector.load %arg6[%c0_13, %c0_14, %c0_15] : memref<1x1x128xi32, #tpu.memory_space<vmem>>, vector<1x1x128xi32>
    %33 = vector.shape_cast %32 : vector<1x1x128xi32> to vector<1x128xi32>
    %34 = vector.shape_cast %31 : vector<1x128xi32> to vector<1x1x128xi32>
    tpu.vector_store %arg6[%c0_13, %c0_14, %c0_15], %34 {strides = array<i32>} : memref<1x1x128xi32, #tpu.memory_space<vmem>>, vector<1x1x128xi32>,
    return
  }
  func.func @transform_0(%arg0: i32, %arg1: i32) -> (i32, i32, i32) {
    %c0_i32 = arith.constant 0 : i32
    %c0_i32_0 = arith.constant 0 : i32
    %c0_i32_1 = arith.constant 0 : i32
    return %arg0, %c0_i32, %c0_i32_0 : i32, i32, i32
  }
  func.func @transform_1(%arg0: i32, %arg1: i32) -> (i32, i32, i32) {
    %c0_i32 = arith.constant 0 : i32
    %c0_i32_0 = arith.constant 0 : i32
    %c0_i32_1 = arith.constant 0 : i32
    return %arg0, %c0_i32, %c0_i32_0 : i32, i32, i32
  }
  func.func @transform_2(%arg0: i32, %arg1: i32) -> (i32, i32, i32) {
    %c0_i32 = arith.constant 0 : i32
    %c0_i32_0 = arith.constant 0 : i32
    %c0_i32_1 = arith.constant 0 : i32
    return %arg0, %c0_i32, %c0_i32_0 : i32, i32, i32
  }
  func.func @transform_3(%arg0: i32, %arg1: i32) -> (i32, i32, i32) {
    %c0_i32 = arith.constant 0 : i32
    %c0_i32_0 = arith.constant 0 : i32
    return %arg0, %arg1, %c0_i32 : i32, i32, i32
  }
  func.func @transform_4(%arg0: i32, %arg1: i32) -> (i32, i32, i32) {
    %c0_i32 = arith.constant 0 : i32
    %c0_i32_0 = arith.constant 0 : i32
    return %arg0, %c0_i32, %arg1 : i32, i32, i32
  }
}

</mosaic_0001>

<bundles_post_ra>
// kernel: tpu_custom_call.1
= control target key start
LH: loop header
LB: loop body
LE: loop exit
PB: predicated region body
PF: predicated region fallthrough
CT: control target
= control target key end

     0   :  { %s1606_s0 = inlined_call_operand.hbm [shape: s32[2,1,8], index: 0, kind: input, shape index: {}]   ;;  %s1607_s1 = inlined_call_operand.hbm [shape: s32[2,1,8], index: 1, kind: input, shape index: {}]   ;;  %s1608_s2 = inlined_call_operand.hbm [shape: f32[2,8,128], index: 2, kind: input, shape index: {}]   ;;  %s1609_s3 = inlined_call_operand.hbm [shape: f32[2,128,128], index: 3, kind: output, shape index: {0}]   ;;  %s1610_s4 = inlined_call_operand.hbm [shape: s32[2,1,128], index: 4, kind: output, shape index: {1}]  }
   0x1   :  { %1612 = sst [smem:[#allocation16_spill]] %s1606_s0 }
   0x2   :  { %1613 = sst [smem:[#allocation17_spill]] %s1607_s1 }
   0x3   :  { %10 = vsyncpa [#allocation3], 0 }
   0x4   :  { %12 = vsyncpa [#allocation3 + $0x1], 0 }
   0x5   :  { %13 = vsyncpa [#allocation6], 0 }
   0x6   :  { %15 = vsyncpa [#allocation6 + $0x1], 0 }
   0x7   :  { %16 = vsyncpa [#allocation4], 0 }
   0x8   :  { %18 = vsyncpa [#allocation4 + $0x1], 0 }
   0x9   :  { %19 = vsyncpa [#allocation10], 0 }
   0xa   :  { %21 = vsyncpa [#allocation10 + $0x1], 0  ;;  %s1251_s15 = smov 0   ;;  %s1253_s16 = smov 0  }
   0xb   :  { %s1255_s17 = smov 0   ;;  %s1257_s18 = smov 0  }
   0xc   :  { %s1259_s19 = smov 0   ;;  %s1261_s20 = smov 0  }
   0xd LB: > { %s1282_s21 = sadd.s32 4294967295, %s1215_s20   ;;  %s838_s22 = sadd.s32 4294967294, %s1215_s20   ;;  %s1215_s20 = sphi %s1261_s20, %s27_s20   ;;  %s1211_s19 = sphi %s1259_s19, %s1628_s19   ;;  %s1207_s18 = sphi %s1257_s18, %s1627_s18   ;;  %s1203_s17 = sphi %s1255_s17, %s1626_s17   ;;  %s1199_s16 = sphi %s1253_s16, %s1625_s16   ;;  %s1195_s15 = sphi %s1251_s15, %s1624_s15  }
   0xe   : > { %s39_s23 = sadd.s32 1, %s1211_s19  ;;  %s46_s24 = sadd.s32 1, %s1203_s17 }
   0xf   : > { %p41_p0 = scmp.ge.s32.totalorder %s39_s23, 2  ;;  %p53_p1 = scmp.ne.s32.totalorder %s1203_s17, %s1199_s16 }
  0x10   : > { %p54_p2 = scmp.eq.s32.totalorder %s1215_s20, 0  ;;  %p59_p3 = scmp.ne.s32.totalorder %s1199_s16, %s1195_s15 }
  0x11   : > { %s1630_s23 = smov (%p41_p0, %s39_s23), 0  ;;  %p60_p5 = scmp.eq.s32.totalorder %s1282_s21, 0 }
  0x12   : > { %1614 = sst [smem:[#allocation15_spill]] %s1630_s23  ;;  %p1294_p4 = por %p54_p2, %p53_p1 }
  0x13   : > { %s43_s26 = ssub.s32 %s1211_s19, %s1630_s23  ;;  %p137_p6 = scmp.eq.s32.totalorder %s1282_s21, 1 }
  0x14   : > { %p44_p7 = scmp.eq.s32.totalorder %s43_s26, 0  ;;  %p1302_p8 = por %p60_p5, %p59_p3 }
  0x15   : > { %p1306_p9 = por %p137_p6, %p53_p1  ;;  %p143_p10 = scmp.eq.s32.totalorder %s838_s22, 1 }
  0x16   : > { %s1311_s29 = scalar_select %p44_p7, %s1203_s17, %s46_s24  }
  0x17   : > { %p1313_p11 = por %p143_p10, %p59_p3  ;;  %p840_p12 = scmp.ge.s32.totalorder %s1215_s20, 2 }
  0x18   : > { %p963_p13 = scmp.lt.s32.totalorder %s1215_s20, 2  ;;  %s1320_s5 = sand.u32 1, %s1203_s17  }
  0x19   : > { %s841_s6 = sshll.u32 %s1211_s19, 4  ;;  %s208_s7 = sand.u32 1, %s1215_s20  }
  0x1a   : > { %p1326_p0 = pnand %p963_p13, %p1294_p4  ;;  %s1620_s1 = sld [smem:[#allocation17_spill]] }
  0x1b   : > { %s211_s12 = scalar_lea.vmem [#allocation5], %s1320_s5  ;;  %p845_p1 = scmp.ge.s32.totalorder %s1215_s20, 1 }
  0x1c   : > { %s218_s13 = sshll.u32 %s211_s12, 4  ;;  %s1335_s14 = scalar_lea.sflag [#allocation6], %s208_s7  ;;  %s219_s13 = int_to_ptr.vmem [resolvable:$true] %s218_s13 }
  0x1d   : > { %p1019_p2 = pneg %p1326_p0  ;;  %s1030_s22 = scalar_lea.vmem %s219_s13, 16 }
  0x1e   : > { %p1031_p3 = scmp.ne.s32.totalorder %s219_s13, %s1030_s22  ;;  %s1217_s24 = smov [#allocation5]  }
  0x1f   : > { %s1035_s25 = sshll.u32 %s1217_s24, 4  ;;  %s1036_s25 = int_to_ptr.vmem [resolvable:$false] %s1035_s25 }
  0x20   : > { %s216_s11 = scalar_lea.hbm %s1620_s1, %s841_s6  ;;  %p1033_p4 = pnand %p1031_p3, %p1019_p2 }
  0x21   : > { %s1037_s26 = scalar_lea.vmem %s1036_s25, 32  ;;  %p1038_p6 = scmp.lt.s32.totalorder %s219_s13, %s1036_s25 }
  0x22   : > { %p1034_p5 = pneg %p1033_p4  ;;  %p1039_p7 = scmp.lt.s32.totalorder %s1037_s26, %s1030_s22 }
  0x24   : > { %p1040_p10 = por %p1039_p7, %p1038_p6 }
  0x26   : > { %p1041_p13 = pnand %p1040_p10, %p1034_p5 }
  0x28   : > { %1044 = shalt.err (!%p1041_p13)
}
  0x29   : > { %952 = dma.hbm_to_vmem [thread:$0]  (!%p1326_p0), %s216_s11, 16, %s219_s13, %s1335_s14  }
  0x2a   : > { %p241_p3 = scmp.lt.s32.totalorder %s1215_s20, 3  ;;  %s1622_s0 = sld [smem:[#allocation16_spill]] }
  0x2b   : > { %s194_s22 = scalar_lea.vmem [#allocation2], %s1320_s5  ;;  %s843_s25 = sshll.u32 %s1320_s5, 3 }
  0x2c   : > { %p1348_p4 = pnand %p845_p1, %p241_p3  ;;  %s201_s24 = sshll.u32 %s194_s22, 4  ;;  %s202_s24 = int_to_ptr.vmem [resolvable:$true] %s201_s24 }
  0x2d   : > { %s192_s26 = scalar_lea.sflag [#allocation3], %s1320_s5  ;;  %s1058_s1 = scalar_lea.vmem %s202_s24, 16 }
  0x2e   : > { %p1059_p5 = scmp.ne.s32.totalorder %s202_s24, %s1058_s1  ;;  %s1218_s11 = smov [#allocation2]  }
  0x2f   : > { %s1063_s13 = sshll.u32 %s1218_s11, 4  ;;  %s1064_s13 = int_to_ptr.vmem [resolvable:$false] %s1063_s13 }
  0x30   : > { %s199_s12 = scalar_lea.hbm %s1622_s0, %s841_s6  ;;  %p1061_p6 = pnand %p1059_p5, %p1019_p2 }
  0x31   : > { %s1065_s23 = scalar_lea.vmem %s1064_s13, 32  ;;  %p1066_p1 = scmp.lt.s32.totalorder %s202_s24, %s1064_s13 }
  0x32   : > { %p1062_p7 = pneg %p1061_p6  ;;  %p1067_p10 = scmp.lt.s32.totalorder %s1065_s23, %s1058_s1 }
  0x34   : > { %p1068_p13 = por %p1067_p10, %p1066_p1 }
  0x36   : > { %p1069_p3 = pnand %p1068_p13, %p1062_p7 }
  0x38   : > { %1072 = shalt.err (!%p1069_p3)
}
  0x39   : > { %949 = dma.hbm_to_vmem [thread:$0]  (!%p1326_p0), %s199_s12, 16, %s202_s24, %s192_s26  }
  0x3a   : > { %s844_s5 = sshll.u32 %s1211_s19, 7  ;;  %s229_s22 = scalar_lea.vmem [#allocation7], %s843_s25 }
  0x3b   : > { %s234_s10 = scalar_lea.hbm %s1608_s2, %s844_s5  ;;  %s236_s0 = sshll.u32 %s229_s22, 4  ;;  %s237_s0 = int_to_ptr.vmem [resolvable:$true] %s236_s0 }
  0x3c   : > { %s1086_s11 = scalar_lea.vmem %s237_s0, 128  ;;  %s1219_s1 = smov [#allocation7]  }
  0x3d   : > { %p1087_p5 = scmp.ne.s32.totalorder %s237_s0, %s1086_s11  ;;  %s1091_s23 = sshll.u32 %s1219_s1, 4  ;;  %s1092_s23 = int_to_ptr.vmem [resolvable:$false] %s1091_s23 }
  0x3e   : > { %s1093_s13 = scalar_lea.vmem %s1092_s23, 256  ;;  %p1094_p1 = scmp.lt.s32.totalorder %s237_s0, %s1092_s23 }
  0x3f   : > { %p1089_p6 = pnand %p1087_p5, %p1019_p2  ;;  %p1095_p10 = scmp.lt.s32.totalorder %s1093_s13, %s1086_s11 }
  0x41   : > { %p1090_p7 = pneg %p1089_p6  ;;  %p1096_p13 = por %p1095_p10, %p1094_p1 }
  0x43   : > { %p1097_p3 = pnand %p1096_p13, %p1090_p7 }
  0x45   : > { %1100 = shalt.err (!%p1097_p3)
}
  0x46   : > { %955 = dma.hbm_to_vmem [thread:$0]  (!%p1326_p0), %s234_s10, 128, %s237_s0, %s1335_s14  }
  0x47   : > { %245 = sbr.rel (%p1348_p4) target bundleno = 313 (0x139), region = 32  ;;  %s1376_s12 = sand.u32 (!%p1348_p4), 1, %s1199_s16  }
  0x48   : > { %s248_s24 = scalar_lea.sflag (!%p1348_p4), [#allocation3], %s1376_s12  ;;  %s250_s25 = scalar_lea.vmem (!%p1348_p4), [#allocation2], %s1376_s12 }
  0x4c   : > { %1178 = dma.done.wait (%p1302_p8), %s248_s24, 16  }
  0x4d   : > { %1180 = vsyncadd (%p1302_p8), %s248_s24, 4294967280  ;;  %s255_s0 = sand.u32 1, %s1282_s21   ;;  %s258_s14 = scalar_lea.vmem [#allocation5], %s1376_s12 }
  0x4e   : > { %s256_s8 = scalar_lea.sflag [#allocation6], %s255_s0 }
  0x4f   : > { %1182 = dma.done.wait (%p1302_p8), %s256_s8, 144  }
  0x50   : > { %1184 = vsyncadd (%p1302_p8), %s256_s8, 4294967152  ;;  %v308_v0 = vlaneseq  ;;  %s846_s7 = sshll.u32 %s1376_s12, 3  ;;  %vm431_vm0 = vcmask 64512   ;;  %v1400_v9 = vld [vmem:[%s250_s25] ss:$0 sm:$0xff]  ;;  %v1220_v15 = vmov 0.0  }
  0x51   : > { %s267_s21 = scalar_lea.vmem [#allocation7], %s846_s7  ;;  %v1402_v10 = vld [vmem:[%s258_s14] ss:$0 sm:$0xff]  ;;  %s1221_s27 = smov 121  }
  0x52   : > { %v1392_v1 = vshrl.u32 %v308_v0, 7  ;;  %v430_v8 = vld [vmem:[%s267_s21] sm:$0xff]  ;;  %v641_v13 = vld [vmem:[%s258_s14] sm:$0x1]  ;;  %v646_v39 = vand.u32 127, %v308_v0  ;;  %s885_s26 = sshll.u32 %s1207_s18, 4 }
  0x53   : > { %906 = vmatprep.subr.mxu0 %v430_v8  ;;  %932 = vmatprep.subr.mxu1 %v430_v8  ;;  %s303_s5 = scalar_lea.vmem [#allocation9], %s1376_s12  ;;  %s1513_s11 = scalar_lea.hbm %s1610_s4, %s885_s26 }
  0x54   : > { %v317_v2 = vadd.s32 64, %v1392_v1  ;;  %v310_v3 = vadd.s32 8, %v1392_v1  ;;  %v318_v4 = vadd.s32 72, %v1392_v1  ;;  %v311_v5 = vadd.s32 16, %v1392_v1  ;;  %907 = vmatpush3.msra.mxu0 %v430_v8  ;;  %933 = vmatpush3.msra.mxu1 %v430_v8  ;;  %s690_s6 = sshll.u32 %s303_s5, 4  ;;  %s659_s1 = scalar_lea.sflag [#allocation10], %s1376_s12  ;;  %s691_s6 = int_to_ptr.vmem [resolvable:$true] %s690_s6 }
  0x55   : > { %v319_v6 = vadd.s32 80, %v1392_v1  ;;  %v312_v7 = vadd.s32 24, %v1392_v1  ;;  %v320_v11 = vadd.s32 88, %v1392_v1  ;;  %vm346_vm1 = vcmp.ge.s32.totalorder %v1392_v1, %v1400_v9  ;;  %642 = vrot.lane.b32.xlu0 %v641_v13, %s1221_s27  ;;  %s1101_s23 = scalar_lea.vmem %s691_s6, 16  ;;  %s1222_s13 = smov [#allocation9]  }
  0x56   : > { %vm366_vm2 = vcmp.lt.s32.totalorder %v1392_v1, %v1402_v10  ;;  %vm354_vm3 = vcmp.ge.s32.totalorder %v317_v2, %v1400_v9  ;;  %v313_v12 = vadd.s32 32, %v1392_v1  ;;  %vm374_vm5 = vcmp.lt.s32.totalorder %v317_v2, %v1402_v10  ;;  %p1102_p8 = scmp.ne.s32.totalorder %s691_s6, %s1101_s23  ;;  %s1105_s24 = sshll.u32 %s1222_s13, 4  ;;  %s1106_s24 = int_to_ptr.vmem [resolvable:$false] %s1105_s24 }
  0x57   : > { %vm382_vm4 = vmand %vm346_vm1, %vm366_vm2  ;;  %vm347_vm6 = vcmp.ge.s32.totalorder %v310_v3, %v1400_v9  ;;  %vm367_vm7 = vcmp.lt.s32.totalorder %v310_v3, %v1402_v10  ;;  %v321_v14 = vadd.s32 96, %v1392_v1  ;;  %vm355_vm9 = vcmp.ge.s32.totalorder %v318_v4, %v1400_v9  ;;  %s1107_s25 = scalar_lea.vmem %s1106_s24, 32  ;;  %p1108_p4 = scmp.lt.s32.totalorder %s691_s6, %s1106_s24 }
  0x58   : > { %v850_v16 = vsel %vm382_vm4, 1.0, %v1220_v15  ;;  %vm390_vm8 = vmand %vm354_vm3, %vm374_vm5  ;;  %vm375_vm10 = vcmp.lt.s32.totalorder %v318_v4, %v1402_v10  ;;  %vm348_vm11 = vcmp.ge.s32.totalorder %v311_v5, %v1400_v9  ;;  %vm368_vm13 = vcmp.lt.s32.totalorder %v311_v5, %v1402_v10  ;;  %p1103_p0 = pnand %p1102_p8, %p1306_p9  ;;  %p1109_p5 = scmp.lt.s32.totalorder %s1107_s25, %s1101_s23 }
  0x59   : > { %908 = vmatprep.mubr.msk.f32.mxu0 %vm431_vm0, %v850_v16  ;;  %v858_v17 = vsel %vm390_vm8, 1.0, %v1220_v15  ;;  %vm383_vm12 = vmand %vm347_vm6, %vm367_vm7  ;;  %vm356_vm14 = vcmp.ge.s32.totalorder %v319_v6, %v1400_v9  ;;  %vm376_vm15 = vcmp.lt.s32.totalorder %v319_v6, %v1402_v10  ;;  %vm349_vm2 = vcmp.ge.s32.totalorder %v312_v7, %v1400_v9 }
  0x5a   : > { %920 = vmatprep.mubr.msk.f32.mxu1 %vm431_vm0, %v858_v17  ;;  %v851_v18 = vsel %vm383_vm12, 1.0, %v1220_v15  ;;  %vm391_vm1 = vmand %vm355_vm9, %vm375_vm10  ;;  %vm369_vm3 = vcmp.lt.s32.totalorder %v312_v7, %v1402_v10  ;;  %v314_v19 = vadd.s32 40, %v1392_v1  ;;  %vm357_vm5 = vcmp.ge.s32.totalorder %v320_v11, %v1400_v9  ;;  %p1104_p2 = pneg %p1103_p0  ;;  %p1110_p6 = por %p1109_p5, %p1108_p4 }
  0x5b   : > { %909 = vmatmul.mubr.msk.f32.vlgmr.msra.gmra.mxu0 %vm431_vm0, %v851_v18  ;;  %v859_v20 = vsel %vm391_vm1, 1.0, %v1220_v15  ;;  %vm384_vm4 = vmand %vm348_vm11, %vm368_vm13  ;;  %vm377_vm6 = vcmp.lt.s32.totalorder %v320_v11, %v1402_v10  ;;  %v322_v21 = vadd.s32 104, %v1392_v1  ;;  %vm350_vm8 = vcmp.ge.s32.totalorder %v313_v12, %v1400_v9 }
  0x5c   : > { %921 = vmatmul.mubr.msk.f32.vlgmr.msra.gmra.mxu1 %vm431_vm0, %v859_v20  ;;  %v852_v22 = vsel %vm384_vm4, 1.0, %v1220_v15  ;;  %vm392_vm7 = vmand %vm356_vm14, %vm376_vm15  ;;  %vm370_vm9 = vcmp.lt.s32.totalorder %v313_v12, %v1402_v10  ;;  %v315_v23 = vadd.s32 48, %v1392_v1  ;;  %vm358_vm11 = vcmp.ge.s32.totalorder %v321_v14, %v1400_v9  ;;  %p1111_p7 = pnand %p1110_p6, %p1104_p2 }
  0x5d   : > { %911 = vmatprep.mubr.msk.f32.mxu0 %vm431_vm0, %v852_v22  ;;  %v860_v24 = vsel %vm392_vm7, 1.0, %v1220_v15  ;;  %vm385_vm10 = vmand %vm349_vm2, %vm369_vm3  ;;  %vm378_vm12 = vcmp.lt.s32.totalorder %v321_v14, %v1402_v10  ;;  %v323_v25 = vadd.s32 112, %v1392_v1  ;;  %vm351_vm14 = vcmp.ge.s32.totalorder %v314_v19, %v1400_v9 }
  0x5e   : > { %923 = vmatprep.mubr.msk.f32.mxu1 %vm431_vm0, %v860_v24  ;;  %v853_v26 = vsel %vm385_vm10, 1.0, %v1220_v15  ;;  %vm393_vm13 = vmand %vm357_vm5, %vm377_vm6  ;;  %vm371_vm15 = vcmp.lt.s32.totalorder %v314_v19, %v1402_v10  ;;  %v316_v27 = vadd.s32 56, %v1392_v1  ;;  %vm359_vm2 = vcmp.ge.s32.totalorder %v322_v21, %v1400_v9 }
  0x5f   : > { %912 = vmatmul.mubr.msk.f32.gmra.mxu0 %vm431_vm0, %v853_v26  ;;  %v861_v28 = vsel %vm393_vm13, 1.0, %v1220_v15  ;;  %vm386_vm1 = vmand %vm350_vm8, %vm370_vm9  ;;  %vm379_vm3 = vcmp.lt.s32.totalorder %v322_v21, %v1402_v10  ;;  %v324_v29 = vadd.s32 120, %v1392_v1  ;;  %vm352_vm5 = vcmp.ge.s32.totalorder %v315_v23, %v1400_v9 }
  0x60   : > { %924 = vmatmul.mubr.msk.f32.gmra.mxu1 %vm431_vm0, %v861_v28  ;;  %v854_v30 = vsel %vm386_vm1, 1.0, %v1220_v15  ;;  %vm394_vm4 = vmand %vm358_vm11, %vm378_vm12  ;;  %vm372_vm6 = vcmp.lt.s32.totalorder %v315_v23, %v1402_v10  ;;  %vm360_vm8 = vcmp.ge.s32.totalorder %v323_v25, %v1400_v9  ;;  %vm380_vm9 = vcmp.lt.s32.totalorder %v323_v25, %v1402_v10 }
  0x61   : > { %914 = vmatprep.mubr.msk.f32.mxu0 %vm431_vm0, %v854_v30  ;;  %v862_v31 = vsel %vm394_vm4, 1.0, %v1220_v15  ;;  %vm387_vm7 = vmand %vm351_vm14, %vm371_vm15  ;;  %vm353_vm11 = vcmp.ge.s32.totalorder %v316_v27, %v1400_v9  ;;  %vm373_vm12 = vcmp.lt.s32.totalorder %v316_v27, %v1402_v10  ;;  %vm361_vm14 = vcmp.ge.s32.totalorder %v324_v29, %v1400_v9 }
  0x62   : > { %926 = vmatprep.mubr.msk.f32.mxu1 %vm431_vm0, %v862_v31  ;;  %v855_v32 = vsel %vm387_vm7, 1.0, %v1220_v15  ;;  %vm395_vm10 = vmand %vm359_vm2, %vm379_vm3  ;;  %vm381_vm15 = vcmp.lt.s32.totalorder %v324_v29, %v1402_v10  ;;  %v650_v40 = vadd.s32 1, %v646_v39 }
  0x63   : > { %915 = vmatmul.mubr.msk.f32.gmra.mxu0 %vm431_vm0, %v855_v32  ;;  %v863_v33 = vsel %vm395_vm10, 1.0, %v1220_v15  ;;  %vm388_vm13 = vmand %vm352_vm5, %vm372_vm6 }
  0x64   : > { %927 = vmatmul.mubr.msk.f32.gmra.mxu1 %vm431_vm0, %v863_v33  ;;  %v856_v34 = vsel %vm388_vm13, 1.0, %v1220_v15  ;;  %vm396_vm1 = vmand %vm360_vm8, %vm380_vm9 }
  0x65   : > { %917 = vmatprep.mubr.msk.f32.mxu0 %vm431_vm0, %v856_v34  ;;  %v864_v35 = vsel %vm396_vm1, 1.0, %v1220_v15  ;;  %vm389_vm2 = vmand %vm353_vm11, %vm373_vm12 }
  0x66   : > { %929 = vmatprep.mubr.msk.f32.mxu1 %vm431_vm0, %v864_v35  ;;  %v857_v36 = vsel %vm389_vm2, 1.0, %v1220_v15  ;;  %vm397_vm3 = vmand %vm361_vm14, %vm381_vm15 }
  0x67   : > { %918 = vmatmul.mubr.msk.f32.gmra.mxu0 %vm431_vm0, %v857_v36  ;;  %v865_v37 = vsel %vm397_vm3, 1.0, %v1220_v15 }
  0x68   : > { %930 = vmatmul.mubr.msk.f32.gmra.mxu1 %vm431_vm0, %v865_v37 }
  0xc7   : > { %v643_v38 = vpop.permute.xlu0 %642 }
  0xc8   : > { %934 = vpush %v643_v38 }
  0xf9   : > { %s935_s9 = spop %934 }
  0xfa   : > { %v648_v41 = vstv %s935_s9 }
  0xfb   : > { %vm649_vm4 = vcmp.lt.s32.totalorder %v646_v39, %v648_v41 }
  0xfc   : > { %v651_v42 = vsel %vm649_vm4, %v650_v40, 0 }
  0xfd   : > { %652 = vst [vmem:[%s303_s5] sm:$0x1] %v651_v42 }
  0xfe   : > { %1114 = shalt.err (!%p1111_p7)
}
  0xff   : > { %s1115_s0 = scalar_lea.hbm %s1513_s11, 16  ;;  %s1119_s7 = scalar_lea.hbm %s1610_s4, 32 }
 0x100   : > { %p1116_p1 = scmp.ne.s32.totalorder %s1513_s11, %s1115_s0  ;;  %p1120_p3 = scmp.lt.s32.totalorder %s1513_s11, %s1610_s4 }
 0x101   : > { %p1121_p8 = scmp.lt.s32.totalorder %s1119_s7, %s1115_s0 }
 0x102   : > { %p1117_p10 = pnand %p1116_p1, %p1306_p9 }
 0x103   : > { %p1122_p0 = por %p1121_p8, %p1120_p3 }
 0x104   : > { %p1118_p13 = pneg %p1117_p10 }
 0x106   : > { %p1123_p2 = pnand %p1122_p0, %p1118_p13 }
 0x108   : > { %1126 = shalt.err (!%p1123_p2)
}
 0x109   : > { %943 = dma.vmem_to_hbm [thread:$0]  (%p1306_p9), %s691_s6, 16, %s1513_s11, %s659_s1  }
 0x10a   : > { %s847_s26 = sshll.u32 %s1376_s12, 7  ;;  %s888_s6 = sshll.u32 %s1207_s18, 11 }
 0x10b   : > { %s1533_s5 = scalar_lea.vmem [#allocation8], %s847_s26  ;;  %s1553_s11 = scalar_lea.hbm %s1609_s3, %s888_s6 }
 0x10c   : > { %s673_s9 = sshll.u32 %s1533_s5, 4  ;;  %s654_s18 = scalar_lea.sflag [#allocation4], %s1376_s12  ;;  %s1555_s9 = int_to_ptr.vmem [resolvable:$true] %s673_s9 }
 0x10d   : > { %s1127_s1 = scalar_lea.vmem %s1555_s9, 2048  ;;  %s1223_s23 = smov [#allocation8]  }
 0x10e   : > { %p1128_p4 = scmp.ne.s32.totalorder %s1555_s9, %s1127_s1  ;;  %s1131_s13 = sshll.u32 %s1223_s23, 4  ;;  %s1132_s13 = int_to_ptr.vmem [resolvable:$false] %s1131_s13 }
 0x10f   : > { %s1133_s24 = scalar_lea.vmem %s1132_s13, 4096  ;;  %p1134_p7 = scmp.lt.s32.totalorder %s1555_s9, %s1132_s13 }
 0x110   : > { %p1129_p5 = pnand %p1128_p4, %p1306_p9  ;;  %p1135_p1 = scmp.lt.s32.totalorder %s1133_s24, %s1127_s1 }
 0x112   : > { %p1130_p6 = pneg %p1129_p5  ;;  %p1136_p10 = por %p1135_p1, %p1134_p7 }
 0x114   : > { %p1137_p13 = pnand %p1136_p10, %p1130_p6 }
 0x11b   : > { %v910_v43 = vpop.f32.mrf.mxu0 }
 0x11c   : > { %626 = vst [vmem:[%s1533_s5 + $0x8] sm:$0xff] %v910_v43  ;;  %v922_v44 = vpop.f32.mrf.mxu1 }
 0x11d   : > { %634 = vst [vmem:[%s1533_s5 + $0x48] sm:$0xff] %v922_v44  ;;  %v546_v45 = vpop.f32.mrf.mxu0 }
 0x11e   : > { %625 = vst [vmem:[%s1533_s5] sm:$0xff] %v546_v45  ;;  %v586_v46 = vpop.f32.mrf.mxu1 }
 0x11f   : > { %633 = vst [vmem:[%s1533_s5 + $0x40] sm:$0xff] %v586_v46  ;;  %v913_v47 = vpop.f32.mrf.mxu0 }
 0x120   : > { %628 = vst [vmem:[%s1533_s5 + $0x18] sm:$0xff] %v913_v47  ;;  %v925_v48 = vpop.f32.mrf.mxu1 }
 0x121   : > { %636 = vst [vmem:[%s1533_s5 + $0x58] sm:$0xff] %v925_v48  ;;  %v556_v49 = vpop.f32.mrf.mxu0 }
 0x122   : > { %627 = vst [vmem:[%s1533_s5 + $0x10] sm:$0xff] %v556_v49  ;;  %v596_v50 = vpop.f32.mrf.mxu1 }
 0x123   : > { %635 = vst [vmem:[%s1533_s5 + $0x50] sm:$0xff] %v596_v50  ;;  %v916_v51 = vpop.f32.mrf.mxu0 }
 0x124   : > { %630 = vst [vmem:[%s1533_s5 + $0x28] sm:$0xff] %v916_v51  ;;  %v928_v52 = vpop.f32.mrf.mxu1 }
 0x125   : > { %638 = vst [vmem:[%s1533_s5 + $0x68] sm:$0xff] %v928_v52  ;;  %v566_v53 = vpop.f32.mrf.mxu0 }
 0x126   : > { %629 = vst [vmem:[%s1533_s5 + $0x20] sm:$0xff] %v566_v53  ;;  %v606_v54 = vpop.f32.mrf.mxu1 }
 0x127   : > { %637 = vst [vmem:[%s1533_s5 + $0x60] sm:$0xff] %v606_v54  ;;  %v919_v55 = vpop.f32.mrf.mxu0 }
 0x128   : > { %632 = vst [vmem:[%s1533_s5 + $0x38] sm:$0xff] %v919_v55  ;;  %v931_v56 = vpop.f32.mrf.mxu1 }
 0x129   : > { %640 = vst [vmem:[%s1533_s5 + $0x78] sm:$0xff] %v931_v56  ;;  %v576_v57 = vpop.f32.mrf.mxu0 }
 0x12a   : > { %631 = vst [vmem:[%s1533_s5 + $0x30] sm:$0xff] %v576_v57  ;;  %v616_v58 = vpop.f32.mrf.mxu1 }
 0x12b   : > { %639 = vst [vmem:[%s1533_s5 + $0x70] sm:$0xff] %v616_v58 }
 0x12c   : > { %1140 = shalt.err (!%p1137_p13)
}
 0x12d   : > { %s1141_s25 = scalar_lea.hbm %s1553_s11, 2048  ;;  %s1145_s14 = scalar_lea.hbm %s1609_s3, 4096 }
 0x12e   : > { %p1142_p3 = scmp.ne.s32.totalorder %s1553_s11, %s1141_s25  ;;  %p1146_p2 = scmp.lt.s32.totalorder %s1553_s11, %s1609_s3 }
 0x12f   : > { %p1147_p4 = scmp.lt.s32.totalorder %s1145_s14, %s1141_s25 }
 0x130   : > { %p1143_p8 = pnand %p1142_p3, %p1306_p9 }
 0x131   : > { %p1148_p5 = por %p1147_p4, %p1146_p2 }
 0x132   : > { %p1144_p0 = pneg %p1143_p8 }
 0x134   : > { %p1149_p6 = pnand %p1148_p5, %p1144_p0 }
 0x136   : > { %1152 = shalt.err (!%p1149_p6)
}
 0x137   : > { %s1224_s27 = smov 128   ;;  %s1225_s26 = smov 8  }
 0x138   : > { %942 = dma.vmem_to_hbm [thread:$0]  (%p1306_p9), %s1555_s9, 2048, %s1553_s11, %s654_s18, %s1224_s27, %s1224_s27, %s1225_s26  }
 0x139 PF: > { %s702_s5 = sand.u32 1, %s1195_s15   ;;  %p957_p7 = pnand %p840_p12, %p1313_p11 }
 0x13a   : > { %s703_s6 = scalar_lea.sflag [#allocation4], %s702_s5 }
 0x13b   : > { %p958_p1 = pneg %p957_p7 }
 0x13d   : > { %1186 = dma.done.wait (%p958_p1), %s703_s6, 2048  }
 0x13e   : > { %1188 = vsyncadd (%p958_p1), %s703_s6, 4294965248  ;;  %s712_s10 = scalar_lea.sflag [#allocation10], %s702_s5 }
 0x13f   : > { %1190 = dma.done.wait (%p958_p1), %s712_s10, 16  }
 0x140   : > { %1192 = vsyncadd (%p958_p1), %s712_s10, 4294967280  ;;  %s27_s20 = sadd.s32 1, %s1215_s20   ;;  %s1623_s28 = sld [smem:[#allocation15_spill]] }
 0x141   : > { %p24_p10 = scmp.ge.s32.totalorder %s27_s20, 4   ;;  %s1624_s15 = smov %s1199_s16 }
 0x142   : > { %s1625_s16 = smov %s1203_s17  ;;  %s1626_s17 = smov %s1311_s29 }
 0x143   : > { %s1627_s18 = smov %s1211_s19  ;;  %26 = sbr.rel (!%p24_p10) target bundleno = 13 (0xd), region = 118 }
 0x146   : > { %s1628_s19 = smov %s1623_s28 }
 0x148   :  { %716 = vsyncpa [#allocation3], 1 }
 0x149   :  { %718 = vsyncpa [#allocation3 + $0x1], 1 }
 0x14a   :  { %719 = vsyncpa [#allocation6], 1 }
 0x14b   :  { %721 = vsyncpa [#allocation6 + $0x1], 1 }
 0x14c   :  { %722 = vsyncpa [#allocation4], 1 }
 0x14d   :  { %724 = vsyncpa [#allocation4 + $0x1], 1 }
 0x14e   :  { %725 = vsyncpa [#allocation10], 1 }
 0x14f   :  { %727 = vsyncpa [#allocation10 + $0x1], 1 }

</bundles_post_ra>
